<compile_context>
chip_gen: v5e
topology: v5e:2x2
jax: 0.10.0
libtpu: 0.0.40
codegen_flags: <defaults>
</compile_context>

<pallas_src>
import jax
import jax.numpy as jnp
from jax.experimental import pallas as pl
from jax.experimental.pallas import tpu as pltpu


def _round_up(x: int, m: int) -> int:
    return ((x + m - 1) // m) * m


def _choose_vocab_tile(d: int, v: int, *, weight_bytes: int = 2,
                       vmem_budget: int = 40 << 20) -> int:
    """Largest 128-multiple vocab tile (<= 2048) whose double-buffered bf16
    weight tile fits the VMEM budget (safe within v7x's 64 MiB physical VMEM)."""
    by_vmem = vmem_budget // (2 * d * weight_bytes)
    tv = min(2048, by_vmem, _round_up(v, 128))
    return max(128, (tv // 128) * 128)


def lm_head(hidden_states, norm_weight, lm_weight, *, eps: float = 1e-5,
            tv: int | None = None, tn: int | None = None,
            out_dtype=jnp.float32):
    """Fused final RMSNorm + lm_head.

    hidden_states: (B, S, D) float
    norm_weight  : (D,) or (1, D) float   -- final RMSNorm weight
    lm_weight    : (D, V)                 -- lm_head weight, (in, out) == torch weight.T
    Returns logits (B, S, V) in `out_dtype`.
    """
    B, S, D = hidden_states.shape
    Dw, V = lm_weight.shape
    assert Dw == D, "lm_weight must have shape (D, V)"
    N = B * S

    # Flatten batch*seq into a sublane-dense LHS; normalize in f32.
    x2 = hidden_states.reshape(N, D).astype(jnp.float32)

    # Fold the RMSNorm scale into the projection weight (f32 fold, bf16 store).
    wn = norm_weight.reshape(-1).astype(jnp.float32)
    w = (wn[:, None] * lm_weight.astype(jnp.float32)).astype(jnp.bfloat16)

    # ---- tile selection ------------------------------------------------
    if tv is None:
        tv = _choose_vocab_tile(D, V)
    tv = max(128, (min(tv, _round_up(V, 128)) // 128) * 128)
    if tn is None:
        tn = N if N <= 256 else 256          # decode: one resident row tile
    tn = _round_up(min(tn, N), 8)

    n_tiles = pl.cdiv(N, tn)
    v_tiles = pl.cdiv(V, tv)
    n_pad, v_pad = n_tiles * tn, v_tiles * tv
    if n_pad != N:
        x2 = jnp.pad(x2, ((0, n_pad - N), (0, 0)))       # zero rows -> zero logits
    if v_pad != V:
        w = jnp.pad(w, ((0, 0), (0, v_pad - V)))          # zero cols -> sliced off

    out_bytes = jnp.dtype(out_dtype).itemsize

    # Advisory cost: this op streams the whole (bf16) weight from HBM.
    cost = pl.CostEstimate(
        flops=2 * n_pad * D * v_pad,
        transcendentals=n_pad * v_tiles,     # one rsqrt per row per vocab tile
        bytes_accessed=2 * D * v_pad + 4 * n_pad * D + out_bytes * n_pad * v_pad,
    )

    # Raise scoped VMEM only when the double-buffered working set needs it.
    work_bytes = 2 * (tn * D * 4) + 2 * (D * tv * 2) + 2 * (tn * tv * out_bytes)
    vmem_limit = None
    if work_bytes > (14 << 20):              # exceeds v5e's 16 MiB scoped default
        vmem_limit = min(work_bytes + (8 << 20), 48 << 20)

    def kernel(x_ref, w_ref, o_ref):
        # x_ref: (tn, D) f32, w_ref: (D, tv) bf16 (norm weight pre-folded),
        # o_ref: (tn, tv) out_dtype.
        x = x_ref[...]
        var = jnp.mean(x * x, axis=-1, keepdims=True)
        h = (x * jax.lax.rsqrt(var + eps)).astype(jnp.bfloat16)
        o_ref[...] = jnp.dot(
            h, w_ref[...], preferred_element_type=jnp.float32
        ).astype(o_ref.dtype)

    grid_spec = pltpu.PrefetchScalarGridSpec(
        num_scalar_prefetch=0,
        grid=(n_tiles, v_tiles),
        in_specs=[
            pl.BlockSpec((tn, D), lambda i, j: (i, 0)),   # row tile (resident over vocab axis)
            pl.BlockSpec((D, tv), lambda i, j: (0, j)),   # streamed weight tile
        ],
        out_specs=pl.BlockSpec((tn, tv), lambda i, j: (i, j)),
    )

    logits = pl.pallas_call(
        kernel,
        out_shape=jax.ShapeDtypeStruct((n_pad, v_pad), out_dtype),
        grid_spec=grid_spec,
        compiler_params=pltpu.CompilerParams(
            dimension_semantics=("parallel", "parallel"),  # v7x: vocab tiles across both TCs
            vmem_limit_bytes=vmem_limit,
        ),
        cost_estimate=cost,
    )(x2, w)

    return logits[:N, :V].reshape(B, S, V)


# ---- pure-JAX reference (mirrors the PyTorch module, no folding) -------------
def reference(hidden_states, norm_weight, lm_weight, eps: float = 1e-5):
    x = hidden_states.astype(jnp.float32)
    var = jnp.mean(x * x, axis=-1, keepdims=True)
    h = x * jax.lax.rsqrt(var + eps) * norm_weight.reshape(-1).astype(jnp.float32)
    return h @ lm_weight.astype(jnp.float32)


if __name__ == "__main__":
    # Small stand-ins for (batch, seq, hidden, vocab).  V is deliberately NOT a
    # multiple of the vocab tile so the pad-and-slice path is exercised
    # (mirrors real V=128256, which only 256/384/768 divide among 128-multiples).
    B, S, D, V = 2, 8, 32, 576

    key = jax.random.PRNGKey(0)
    k0, k1, k2 = jax.random.split(key, 3)
    hidden_states = jax.random.normal(k0, (B, S, D), jnp.float32)
    norm_weight = 1.0 + 0.1 * jax.random.normal(k1, (D,), jnp.float32)
    # lm_head weight stored (in, out) == transposed torch nn.Linear weight,
    # materialized in bf16 as in the exported (torch_dtype=bfloat16) model.
    lm_weight = (0.05 * jax.random.normal(k2, (D, V), jnp.float32)).astype(jnp.bfloat16)

    ref = reference(hidden_states, norm_weight, lm_weight).reshape(B, S, V)

    # 1) explicit small vocab tile -> multi-step grid + padded last vocab tile.
    out = jax.block_until_ready(lm_head(hidden_states, norm_weight, lm_weight, tv=256))
    assert out.shape == (B, S, V)
    err = float(jnp.max(jnp.abs(out - ref)))
    assert err < 2e-2, f"mismatch vs reference (tv=256): {err}"

    # 2) automatic tile selection (the path production-scale D=4096/V=128256 uses).
    out2 = jax.block_until_ready(lm_head(hidden_states, norm_weight, lm_weight))
    assert out2.shape == (B, S, V)
    err2 = float(jnp.max(jnp.abs(out2 - ref)))
    assert err2 < 2e-2, f"mismatch vs reference (auto tv): {err2}"

    print("KERNEL_OK")
</pallas_src>

<mosaic_0001>
module attributes {stable_mosaic.version = 11 : i64} {
  func.func @kernel(%arg0: i32, %arg1: i32, %arg2: memref<16x32xf32, #tpu.memory_space<vmem>>, %arg3: memref<32x256xbf16, #tpu.memory_space<vmem>>, %arg4: memref<16x256xf32, #tpu.memory_space<vmem>>) attributes {dimension_semantics = [#tpu.dimension_semantics<parallel>, #tpu.dimension_semantics<parallel>], iteration_bounds = array<i64: 1, 3>, scalar_prefetch = 0 : i64, scratch_operands = 0 : i64, tpu.core_type = #tpu.core_type<tc>, window_params = [{transform_indices = @transform_0, window_bounds = array<i64: 16, 32>}, {transform_indices = @transform_1, window_bounds = array<i64: 32, 256>}, {transform_indices = @transform_2, window_bounds = array<i64: 16, 256>}]} {
    %c0 = arith.constant 0 : index
    %c0_0 = arith.constant 0 : index
    %0 = vector.load %arg2[%c0, %c0_0] : memref<16x32xf32, #tpu.memory_space<vmem>>, vector<16x32xf32>
    %1 = arith.mulf %0, %0 : vector<16x32xf32>
    %cst = arith.constant dense<0.000000e+00> : vector<16xf32>
    %2 = vector.multi_reduction <add>, %1, %cst [1] : vector<16x32xf32> to vector<16xf32>
    %3 = vector.shape_cast %2 : vector<16xf32> to vector<16x1xf32>
    %cst_1 = arith.constant 3.200000e+01 : f32
    %4 = vector.broadcast %cst_1 : f32 to vector<16x1xf32>
    %5 = arith.divf %3, %4 : vector<16x1xf32>
    %cst_2 = arith.constant 9.99999974E-6 : f32
    %6 = vector.broadcast %cst_2 : f32 to vector<16x1xf32>
    %7 = arith.addf %5, %6 : vector<16x1xf32>
    %8 = math.rsqrt %7 : vector<16x1xf32>
    %9 = vector.broadcast %8 : vector<16x1xf32> to vector<16x32xf32>
    %10 = arith.mulf %0, %9 : vector<16x32xf32>
    %11 = arith.truncf %10 : vector<16x32xf32> to vector<16x32xbf16>
    %c0_3 = arith.constant 0 : index
    %c0_4 = arith.constant 0 : index
    %12 = vector.load %arg3[%c0_3, %c0_4] : memref<32x256xbf16, #tpu.memory_space<vmem>>, vector<32x256xbf16>
    %cst_5 = arith.constant dense<0.000000e+00> : vector<16x256xf32>
    %13 = tpu.matmul %11, %12, %cst_5 {dimension_numbers = #tpu.dot_dimension_numbers<[1], [0], [0], [1], [0, 0, 1, 1], [], []>} : vector<16x32xbf16>, vector<32x256xbf16>, vector<16x256xf32> -> vector<16x256xf32>
    %c0_6 = arith.constant 0 : index
    %c0_7 = arith.constant 0 : index
    %14 = vector.load %arg4[%c0_6, %c0_7] : memref<16x256xf32, #tpu.memory_space<vmem>>, vector<16x256xf32>
    tpu.vector_store %arg4[%c0_6, %c0_7], %13 {strides = array<i32>} : memref<16x256xf32, #tpu.memory_space<vmem>>, vector<16x256xf32>,
    return
  }
  func.func @transform_0(%arg0: i32, %arg1: i32) -> (i32, i32) {
    %c0_i32 = arith.constant 0 : i32
    %c0_i32_0 = arith.constant 0 : i32
    return %arg0, %c0_i32 : i32, i32
  }
  func.func @transform_1(%arg0: i32, %arg1: i32) -> (i32, i32) {
    %c0_i32 = arith.constant 0 : i32
    %c0_i32_0 = arith.constant 0 : i32
    return %c0_i32, %arg1 : i32, i32
  }
  func.func @transform_2(%arg0: i32, %arg1: i32) -> (i32, i32) {
    %c0_i32 = arith.constant 0 : i32
    return %arg0, %arg1 : i32, i32
  }
}

</mosaic_0001>

<bundles_post_ra>
// kernel: tpu_custom_call.1
= control target key start
LH: loop header
LB: loop body
LE: loop exit
PB: predicated region body
PF: predicated region fallthrough
CT: control target
= control target key end

     0   :  { %7 = vsyncpa [#allocation3], 0  ;;  %s902_s0 = inlined_call_operand.hbm [shape: f32[16,32], index: 0, kind: input, shape index: {}]   ;;  %s903_s1 = inlined_call_operand.hbm [shape: bf16[32,768], index: 1, kind: input, shape index: {}]   ;;  %s904_s2 = inlined_call_operand.hbm [shape: f32[16,768], index: 2, kind: output, shape index: {}]  }
   0x1   :  { %8 = vsyncpa [#allocation6], 0 }
   0x2   :  { %10 = vsyncpa [#allocation6 + $0x1], 0 }
   0x3   :  { %11 = vsyncpa [#allocation4], 0 }
   0x4   :  { %13 = vsyncpa [#allocation4 + $0x1], 0  ;;  %s727_s9 = smov 0   ;;  %s729_s10 = smov 0  }
   0x5   :  { %s731_s11 = smov 0   ;;  %s733_s12 = smov 0  }
   0x6   :  { %s735_s13 = smov 0   ;;  %s737_s14 = smov 0  }
   0x7 LB: > { %s429_s15 = sadd.s32 4294967295, %s702_s14   ;;  %s430_s16 = sadd.s32 4294967294, %s702_s14   ;;  %s702_s14 = sphi %s737_s14, %s19_s14   ;;  %s698_s13 = sphi %s735_s13, %s918_s13   ;;  %s694_s12 = sphi %s733_s12, %s917_s12   ;;  %s690_s11 = sphi %s731_s11, %s916_s11   ;;  %s686_s10 = sphi %s729_s10, %s915_s10   ;;  %s682_s9 = sphi %s727_s9, %s914_s9  }
   0x8   : > { %p77_p0 = scmp.ne.s32.totalorder %s686_s10, %s682_s9  ;;  %p761_p1 = scmp.eq.s32.totalorder %s429_s15, 0 }
   0x9   : > { %p765_p2 = scmp.eq.s32.totalorder %s429_s15, 2  ;;  %p109_p3 = scmp.eq.s32.totalorder %s430_s16, 2 }
   0xa   : > { %p771_p4 = por %p761_p1, %p77_p0  ;;  %p431_p5 = scmp.ge.s32.totalorder %s702_s14, 1 }
   0xb   : > { %p776_p6 = por %p109_p3, %p77_p0  ;;  %p116_p7 = scmp.lt.s32.totalorder %s702_s14, 4 }
   0xc   : > { %s130_s23 = sshll.u32 %s902_s0, 4  ;;  %s704_s25 = smov [#allocation2]   ;;  %s131_s23 = int_to_ptr.hbm [resolvable:$true] %s130_s23 }
   0xd   : > { %p784_p8 = pnand %p431_p5, %p116_p7  ;;  %s132_s26 = sshll.u32 %s704_s25, 4  ;;  %s133_s26 = int_to_ptr.vmem [resolvable:$true] %s132_s26 }
   0xe   : > { %s905_s27 = smov 128   ;;  %s706_s28 = smov 8  }
   0xf   : > { %p478_p9 = pneg %p784_p8  ;;  %s28_s29 = sadd.s32 1, %s698_s13 }
  0x10   : > { %p29_p11 = scmp.ge.s32.totalorder %s28_s29, 3  ;;  %s64_s30 = sadd.s32 1, %s690_s11 }
  0x11   : > { %p479_p10 = pnand %p478_p9, %p761_p1  ;;  %p71_p12 = scmp.ne.s32.totalorder %s690_s11, %s686_s10 }
  0x12   : > { %p72_p13 = scmp.eq.s32.totalorder %s702_s14, 0  ;;  %s920_s29 = smov (%p29_p11, %s28_s29), 0 }
  0x13   : > { %481 = dma.hbm_to_vmem [thread:$0]  (!%p479_p10), %s131_s23, 256, %s133_s26, [#allocation3], %s905_s27, %s905_s27, %s706_s28  }
  0x14   : > { %p802_p0 = por %p72_p13, %p71_p12  ;;  %p808_p3 = por %p765_p2, %p71_p12 }
  0x15   : > { %s61_s5 = ssub.s32 %s698_s13, %s920_s29  ;;  %p491_p5 = scmp.lt.s32.totalorder %s702_s14, 3 }
  0x16   : > { %p62_p7 = scmp.eq.s32.totalorder %s61_s5, 0  ;;  %s146_s6 = sand.u32 1, %s690_s11  }
  0x17   : > { %s434_s7 = sshll.u32 %s146_s6, 5  ;;  %s464_s15 = sshll.u32 %s698_s13, 3 }
  0x18   : > { %s817_s8 = scalar_select %p62_p7, %s690_s11, %s64_s30  }
  0x19   : > { %s155_s22 = scalar_lea.hbm %s903_s1, %s464_s15  ;;  %s150_s23 = scalar_lea.vmem [#allocation5], %s434_s7 }
  0x1a   : > { %s158_s25 = sshll.u32 %s150_s23, 4  ;;  %s156_s18 = sshll.u32 %s155_s22, 4  ;;  %s159_s25 = int_to_ptr.vmem [resolvable:$true] %s158_s25  ;;  %s157_s18 = int_to_ptr.hbm [resolvable:$true] %s156_s18 }
  0x1b   : > { %p483_p2 = pnand %p491_p5, %p802_p0  ;;  %s147_s26 = scalar_lea.sflag [#allocation6], %s146_s6 }
  0x1c   : > { %s707_s27 = smov 384   ;;  %s913_s5 = smov 128  }
  0x1d   : > { %485 = dma.hbm_to_vmem [thread:$0]  (!%p483_p2), %s157_s18, 512, %s159_s25, %s147_s26, %s707_s27, %s913_s5, %s706_s28  }
  0x1e   : > { %170 = sbr.rel (%p784_p8) target bundleno = 334 (0x14e), region = 28 }
  0x23   : > { %669 = dma.done.wait (%p761_p1), [#allocation3], 256  }
  0x24   : > { %671 = vsyncadd (%p761_p1), [#allocation3], 4294967040  ;;  %s834_s30 = sand.u32 1, %s686_s10  }
  0x25   : > { %s439_s3 = sshll.u32 %s834_s30, 5  ;;  %s178_s6 = scalar_lea.sflag [#allocation6], %s834_s30 }
  0x26   : > { %s840_s27 = scalar_lea.vmem [#allocation5], %s439_s3 }
  0x27   : > { %673 = dma.done.wait (%p771_p4), %s178_s6, 512  }
  0x28   : > { %675 = vsyncadd (%p771_p4), %s178_s6, 4294966784  ;;  %v846_v0 = vld [vmem:[#allocation2] sm:$0xff]  ;;  %vm212_vm0 = vcmask 261120   ;;  %v209_v2 = vld [vmem:[#allocation2 + $0x8] sm:$0xff]  ;;  %v708_v6 = vmov 32.0   ;;  %s469_s17 = sshll.u32 %s694_s12, 4 }
  0x29   : > { %v210_v1 = vmul.f32 %v846_v0, %v846_v0  ;;  %v211_v4 = vmul.f32 %v209_v2, %v209_v2  ;;  %550 = vrcp.f32 %v708_v6  ;;  %v451_v11 = vld [vmem:[%s840_s27 + $0x10] sm:$0xf]  ;;  %v468_v12 = vld [vmem:[%s840_s27 + $0x14] sm:$0xf0]  ;;  %v467_v13 = vld [vmem:[%s840_s27 + $0x14] sm:$0xf]  ;;  %s327_s7 = scalar_lea.hbm %s904_s2, %s469_s17 }
  0x2a   : > { %v452_v15 = vor.u32 %v468_v12, %v451_v11  ;;  %v453_v16 = vld [vmem:[%s840_s27 + $0x18] sm:$0xf0]  ;;  %v443_v18 = vld [vmem:[%s840_s27] sm:$0xf]  ;;  %v466_v19 = vld [vmem:[%s840_s27 + $0x4] sm:$0xf0] }
  0x2b   : > { %v213_v3 = vsel %vm212_vm0, %v210_v1, 0.0  ;;  %v216_v5 = vsel %vm212_vm0, %v211_v4, 0.0  ;;  %v456_v17 = vor.u32 %v467_v13, %v453_v16  ;;  %v465_v20 = vld [vmem:[%s840_s27 + $0x4] sm:$0xf]  ;;  %v444_v21 = vor.u32 %v466_v19, %v443_v18  ;;  %v445_v22 = vld [vmem:[%s840_s27 + $0x8] sm:$0xf0] }
  0x2c   : > { %214 = vadd.xlane.f32.xlu0 %v213_v3  ;;  %286 = vmatpush.bf16.msra.mxu0 %v452_v15  ;;  %v448_v24 = vor.u32 %v465_v20, %v445_v22  ;;  %s202_s19 = scalar_lea.vmem [#allocation7], %s439_s3  ;;  %s330_s16 = sshll.u32 %s327_s7, 4  ;;  %s331_s16 = int_to_ptr.hbm [resolvable:$true] %s330_s16 }
  0x2d   : > { %300 = vmatpush.bf16.msra.mxu1 %v456_v17  ;;  %s328_s15 = sshll.u32 %s202_s19, 4  ;;  %s313_s12 = scalar_lea.sflag [#allocation4], %s834_s30  ;;  %s329_s15 = int_to_ptr.vmem [resolvable:$true] %s328_s15 }
  0x2e   : > { %s630_s21 = sshra.s32 %s331_s16, 4  ;;  %s636_s18 = scalar_lea.hbm %s904_s2, 96  ;;  %s631_s21 = int_to_ptr.hbm [resolvable:$true] %s630_s21 }
  0x2f   : > { %v551_v7 = vpop.eup %550  ;;  %s632_s22 = scalar_lea.hbm %s631_s21, 32  ;;  %p637_p9 = scmp.lt.s32.totalorder %s631_s21, %s904_s2 }
  0x30   : > { %v220_v8 = vmul.f32 32.0, %v551_v7  ;;  %vm224_vm1 = vweird.f32 %v551_v7  ;;  %287 = vmatpush.bf16.msra.mxu0 %v444_v21  ;;  %p633_p1 = scmp.ne.s32.totalorder %s631_s21, %s632_s22  ;;  %p638_p10 = scmp.lt.s32.totalorder %s636_s18, %s632_s22 }
  0x31   : > { %301 = vmatpush.bf16.msra.mxu1 %v448_v24 }
  0x32   : > { %v221_v9 = vsub.f32 1.0, %v220_v8  ;;  %p634_p4 = pnand %p633_p1, %p808_p3  ;;  %p639_p11 = por %p638_p10, %p637_p9 }
  0x34   : > { %217 = vadd.xlane.f32.xlu0 %v216_v5  ;;  %v222_v10 = vmul.f32 %v551_v7, %v221_v9  ;;  %p635_p8 = pneg %p634_p4 }
  0x36   : > { %v223_v14 = vadd.f32 %v551_v7, %v222_v10  ;;  %p640_p12 = pnand %p639_p11, %p635_p8 }
  0x38   : > { %v225_v23 = vsel %vm224_vm1, %v551_v7, %v223_v14 }
  0x9f   : > { %v215_v25 = vpop.xlane.xlu0 %214 }
  0xa0   : > { %v226_v26 = vmul.f32 %v225_v23, %v215_v25 }
  0xa2   : > { %v228_v27 = vadd.f32 1e-05, %v226_v26 }
  0xa4   : > { %552 = vrsqrt.f32 %v228_v27  ;;  %vm236_vm3 = vweird.f32 %v228_v27 }
  0xa7   : > { %v218_v28 = vpop.xlane.xlu0 %217 }
  0xa8   : > { %v227_v29 = vmul.f32 %v225_v23, %v218_v28 }
  0xaa   : > { %v553_v30 = vpop.eup %552  ;;  %v229_v31 = vadd.f32 1e-05, %v227_v29 }
  0xab   : > { %v231_v32 = vmul.f32 %v553_v30, %v228_v27  ;;  %vm237_vm2 = vweird.f32 %v553_v30 }
  0xac   : > { %554 = vrsqrt.f32 %v229_v31  ;;  %vm238_vm5 = vmor %vm236_vm3, %vm237_vm2  ;;  %vm246_vm6 = vweird.f32 %v229_v31 }
  0xad   : > { %v232_v33 = vmul.f32 %v553_v30, %v231_v32 }
  0xaf   : > { %v233_v34 = vmul.f32 0.5, %v232_v33 }
  0xb1   : > { %v234_v36 = vsub.f32 1.5, %v233_v34 }
  0xb2   : > { %v555_v35 = vpop.eup %554 }
  0xb3   : > { %v241_v37 = vmul.f32 %v555_v35, %v229_v31  ;;  %v235_v39 = vmul.f32 %v553_v30, %v234_v36  ;;  %vm247_vm4 = vweird.f32 %v555_v35 }
  0xb4   : > { %vm248_vm7 = vmor %vm246_vm6, %vm247_vm4 }
  0xb5   : > { %v242_v38 = vmul.f32 %v555_v35, %v241_v37  ;;  %v239_v43 = vsel %vm238_vm5, %v553_v30, %v235_v39 }
  0xb6   : > { %v250_v45 = vmul.f32 %v239_v43, %v846_v0 }
  0xb7   : > { %v243_v40 = vmul.f32 0.5, %v242_v38 }
  0xb9   : > { %v244_v41 = vsub.f32 1.5, %v243_v40 }
  0xbb   : > { %v245_v42 = vmul.f32 %v555_v35, %v244_v41 }
  0xbd   : > { %v249_v44 = vsel %vm248_vm7, %v555_v35, %v245_v42 }
  0xbe   : > { %v251_v46 = vmul.f32 %v249_v44, %v209_v2 }
  0xc0   : > { %v252_v47 = vpack.c.bf16 %v251_v46, %v250_v45 }
  0xc2   : > { %457 = vmatmul.msk.bf16.vlgmr.msra.gmra.mxu0 %vm212_vm0, %v252_v47  ;;  %458 = vmatmul.msk.bf16.vlgmr.msra.gmra.mxu1 %vm212_vm0, %v252_v47 }
 0x13f   : > { %v289_v48 = vpop.f32.mrf.mxu0  ;;  %v303_v49 = vpop.f32.mrf.mxu1 }
 0x140   : > { %308 = vst [vmem:[%s202_s19] sm:$0xff] %v289_v48 }
 0x141   : > { %309 = vst [vmem:[%s202_s19 + $0x8] sm:$0xff] %v303_v49 }
 0x147   : > { %v291_v50 = vpop.f32.mrf.mxu0  ;;  %v305_v51 = vpop.f32.mrf.mxu1 }
 0x148   : > { %310 = vst [vmem:[%s202_s19 + $0x10] sm:$0xff] %v291_v50 }
 0x149   : > { %311 = vst [vmem:[%s202_s19 + $0x18] sm:$0xff] %v305_v51 }
 0x14a   : > { %643 = shalt.err (!%p640_p12)
}
 0x14b   : > { %s709_s30 = smov 256   ;;  %s710_s3 = smov 768  }
 0x14c   : > { %s711_s6 = smov 16  }
 0x14d   : > { %476 = dma.vmem_to_hbm [thread:$0]  (%p808_p3), %s329_s15, 512, %s331_s16, %s313_s12, %s709_s30, %s710_s3, %s711_s6  }
 0x14e PF: > { %p493_p13 = scmp.ge.s32.totalorder %s702_s14, 2  ;;  %s345_s27 = sand.u32 1, %s682_s9  }
 0x14f   : > { %s346_s17 = scalar_lea.sflag [#allocation4], %s345_s27 }
 0x150   : > { %p487_p0 = pnand %p493_p13, %p776_p6 }
 0x152   : > { %p488_p5 = pneg %p487_p0 }
 0x154   : > { %677 = dma.done.wait (%p488_p5), %s346_s17, 512  }
 0x155   : > { %679 = vsyncadd (%p488_p5), %s346_s17, 4294966784  ;;  %s19_s14 = sadd.s32 1, %s702_s14   ;;  %s914_s9 = smov %s686_s10 }
 0x156   : > { %p16_p7 = scmp.ge.s32.totalorder %s19_s14, 5   ;;  %s915_s10 = smov %s690_s11 }
 0x157   : > { %s916_s11 = smov %s817_s8  ;;  %s917_s12 = smov %s698_s13 }
 0x158   : > { %s918_s13 = smov %s920_s29  ;;  %18 = sbr.rel (!%p16_p7) target bundleno = 7 (0x7), region = 79 }
 0x15d   :  { %352 = vsyncpa [#allocation3], 1 }
 0x15e   :  { %354 = vsyncpa [#allocation3 + $0x1], 1 }
 0x15f   :  { %355 = vsyncpa [#allocation6], 1 }
 0x160   :  { %357 = vsyncpa [#allocation6 + $0x1], 1 }
 0x161   :  { %358 = vsyncpa [#allocation4], 1 }
 0x162   :  { %360 = vsyncpa [#allocation4 + $0x1], 1 }

</bundles_post_ra>
